<compile_context>
chip_gen: v6e
topology: v6e:2x2x1
jax: 0.10.0
libtpu: 0.0.40
codegen_flags: <defaults>
</compile_context>

<pallas_src>
import jax
import jax.numpy as jnp
from jax.experimental import pallas as pl
from jax.experimental.pallas import tpu as pltpu


# ----------------------------------------------------------------------------
# Fused kernel:  o = x @ W  +  [bias_u + scale * (bias_c - bias_u)]
#   where bias_c = emb_cond @ Wc , bias_u = emb_uncond @ Wc  (bias bcast over T)
# ----------------------------------------------------------------------------
def _fused_cfg_kernel(x_ref, w_ref, embc_ref, embu_ref, wc_ref, scale_ref, o_ref):
    Bb, T, F = o_ref.shape

    # Single MXU pass over all rows of this block: (Bb*T, F) @ (F, F).
    x2 = x_ref[...].reshape(Bb * T, F)
    h = jnp.dot(x2, w_ref[...], preferred_element_type=jnp.float32)        # (Bb*T, F)

    # Both conditioning biases in one (Bb, D) @ (D, F) matmul each (hoisted out
    # of any per-batch loop).
    bias_c = jnp.dot(embc_ref[...], wc_ref[...], preferred_element_type=jnp.float32)  # (Bb, F)
    bias_u = jnp.dot(embu_ref[...], wc_ref[...], preferred_element_type=jnp.float32)  # (Bb, F)

    # CFG guidance combine, applied to the bias decomposition (exact algebraic
    # equivalent of out_uncond + s*(out - out_uncond)); kept in f32 on the VPU.
    s = scale_ref[...]                                                      # (Bb, 1)
    eff = bias_u + s * (bias_c - bias_u)                                    # (Bb, F)

    out = h.reshape(Bb, T, F) + eff[:, None, :]                             # bcast over T
    o_ref[...] = out.astype(o_ref.dtype)


def fused_cfg_forward_btf(x_btf, emb_cond, emb_uncond, scale, w, wc, *,
                          batch_blocks=1, mxu_dtype=None):
    """Guided forward in kernel layout. x_btf: (B, T, F); returns (B, T, F)."""
    B, T, F = x_btf.shape
    D = wc.shape[0]
    assert B % batch_blocks == 0
    Bb = B // batch_blocks
    out_dtype = x_btf.dtype

    if mxu_dtype is not None:  # e.g. jnp.bfloat16 on v6e/v7x (f32 accumulation kept)
        x_btf = x_btf.astype(mxu_dtype)
        w = w.astype(mxu_dtype)
        wc = wc.astype(mxu_dtype)
        emb_cond = emb_cond.astype(mxu_dtype)
        emb_uncond = emb_uncond.astype(mxu_dtype)

    scale2 = jnp.asarray(scale).reshape(B, 1).astype(jnp.float32)

    itemsize = jnp.dtype(x_btf.dtype).itemsize
    flops = 2 * B * T * F * F + 4 * B * D * F + 5 * B * F + B * T * F
    bytes_accessed = (
        (x_btf.size + w.size + wc.size + emb_cond.size + emb_uncond.size) * itemsize
        + scale2.size * 4
        + B * T * F * jnp.dtype(out_dtype).itemsize
    )
    cost = pl.CostEstimate(flops=flops, transcendentals=0,
                           bytes_accessed=bytes_accessed)

    return pl.pallas_call(
        _fused_cfg_kernel,
        out_shape=jax.ShapeDtypeStruct((B, T, F), out_dtype),
        grid_spec=pltpu.PrefetchScalarGridSpec(
            num_scalar_prefetch=0,
            grid=(batch_blocks,),
            in_specs=[
                pl.BlockSpec((Bb, T, F), lambda i: (i, 0, 0)),   # x
                pl.BlockSpec((F, F), lambda i: (0, 0)),          # W
                pl.BlockSpec((Bb, D), lambda i: (i, 0)),         # emb_cond
                pl.BlockSpec((Bb, D), lambda i: (i, 0)),         # emb_uncond
                pl.BlockSpec((D, F), lambda i: (0, 0)),          # Wc
                pl.BlockSpec((Bb, 1), lambda i: (i, 0)),         # scale
            ],
            out_specs=pl.BlockSpec((Bb, T, F), lambda i: (i, 0, 0)),
        ),
        compiler_params=pltpu.CompilerParams(dimension_semantics=("parallel",)),
        cost_estimate=cost,
    )(x_btf, w, emb_cond, emb_uncond, wc, scale2)


# ----------------------------------------------------------------------------
# Layout helpers: PyTorch (B, njoints, nfeats, nframes) <-> kernel (B, T, F)
# (only used at the module boundary; keep activations in (B,T,F) across the
# sampling loop via forward_btf)
# ----------------------------------------------------------------------------
def pytorch_to_btf(x):
    B, J, Fe, T = x.shape
    return jnp.transpose(x.reshape(B, J * Fe, T), (0, 2, 1))


def btf_to_pytorch(x_btf, njoints, nfeats):
    B, T, F = x_btf.shape
    return jnp.transpose(x_btf, (0, 2, 1)).reshape(B, njoints, nfeats, T)


# ----------------------------------------------------------------------------
# Synthetic inner diffusion model (stands in for `model` in the PyTorch code).
# It is affine in the conditioning embedding, which is what makes the exact
# algebraic CFG fusion possible.
# ----------------------------------------------------------------------------
class SyntheticMDM:
    def __init__(self, params, njoints, nfeats):
        self.params = params
        self.cond_mask_prob = 0.1        # > 0, required by the CFG wrapper assert
        self.translation = True
        self.njoints = njoints
        self.nfeats = nfeats
        self.data_rep = "rot6d"
        self.cond_mode = "action"

    def embed(self, timesteps, y):
        t_emb = self.params["t_table"][timesteps]                  # (B, D)
        cond_emb = self.params["action_table"][y["action"]]        # (B, D)
        mask = 0.0 if y.get("uncond", False) else 1.0              # mask_cond semantics
        return (t_emb + mask * cond_emb).astype(jnp.float32)

    def __call__(self, x, timesteps, y):
        # Standalone (un-guided) model pass; reuses the fused kernel with
        # emb_cond == emb_uncond so eff_bias == emb @ Wc.
        B = x.shape[0]
        emb = self.embed(timesteps, y)
        x_btf = pytorch_to_btf(x)
        out_btf = fused_cfg_forward_btf(
            x_btf, emb, emb, jnp.ones((B,), jnp.float32),
            self.params["w"], self.params["wc"])
        return btf_to_pytorch(out_btf, self.njoints, self.nfeats)


# ----------------------------------------------------------------------------
# ClassifierFreeSampleModel — same forward semantics as the PyTorch module,
# with the two model calls + CFG combine fused into one Pallas kernel.
# ----------------------------------------------------------------------------
class ClassifierFreeSampleModel:
    def __init__(self, model):
        self.model = model
        assert self.model.cond_mask_prob > 0, \
            "Cannot run a guided diffusion on a model that has not been trained with no conditions"
        self.translation = self.model.translation
        self.njoints = self.model.njoints
        self.nfeats = self.model.nfeats
        self.data_rep = self.model.data_rep
        self.cond_mode = self.model.cond_mode

    def forward_btf(self, x_btf, timesteps, y=None, *, batch_blocks=1, mxu_dtype=None):
        """Kernel-layout entry point: use inside the sampling loop so the
        activation never leaves (B, T, F) layout between steps."""
        cond_mode = self.model.cond_mode
        assert cond_mode in ["text", "action"]
        y_uncond = dict(y)               # shallow copy is enough for these leaves
        y_uncond["uncond"] = True
        # Both conditioning branches are preserved (cond vs. uncond embedding);
        # the two model passes + CFG combine are fused algebraically since the
        # inner model is affine in the embedding.
        emb_cond = self.model.embed(timesteps, y)
        emb_uncond = self.model.embed(timesteps, y_uncond)
        return fused_cfg_forward_btf(
            x_btf, emb_cond, emb_uncond, y["scale"],
            self.model.params["w"], self.model.params["wc"],
            batch_blocks=batch_blocks, mxu_dtype=mxu_dtype)

    def forward(self, x, timesteps, y=None):
        # PyTorch-layout entry point: converts layout exactly once per call.
        out_btf = self.forward_btf(pytorch_to_btf(x), timesteps, y)
        return btf_to_pytorch(out_btf, self.njoints, self.nfeats)


# ----------------------------------------------------------------------------
# Pure-JAX reference: the literal (non-fused) PyTorch semantics
#   out = model(x, t, y); out_uncond = model(x, t, y_uncond)
#   return out_uncond + scale.view(-1,1,1,1) * (out - out_uncond)
# ----------------------------------------------------------------------------
def reference_forward(params, x, timesteps, y):
    B, J, Fe, T = x.shape
    F = J * Fe
    x_btf = jnp.transpose(x.reshape(B, F, T), (0, 2, 1))
    t_emb = params["t_table"][timesteps]
    cond_emb = params["action_table"][y["action"]]

    def inner(mask):
        emb = t_emb + mask * cond_emb
        h = jnp.einsum("btf,fg->btg", x_btf, params["w"])
        bias = emb @ params["wc"]
        o = h + bias[:, None, :]
        return jnp.transpose(o, (0, 2, 1)).reshape(B, J, Fe, T)

    out = inner(1.0)
    out_uncond = inner(0.0)
    return out_uncond + y["scale"].reshape(-1, 1, 1, 1) * (out - out_uncond)


# ----------------------------------------------------------------------------
if __name__ == "__main__":
    B, J, Fe, T = 2, 4, 4, 16       # batch, njoints, nfeats, nframes
    F = J * Fe                       # 16
    D = 32                           # embedding dim
    NUM_ACTIONS, NUM_T = 8, 100

    key = jax.random.PRNGKey(0)
    k1, k2, k3, k4, k5 = jax.random.split(key, 5)
    params = {
        "w": jax.random.normal(k1, (F, F), jnp.float32) * 0.1,
        "wc": jax.random.normal(k2, (D, F), jnp.float32) * 0.1,
        "action_table": jax.random.normal(k3, (NUM_ACTIONS, D), jnp.float32) * 0.1,
        "t_table": jax.random.normal(k4, (NUM_T, D), jnp.float32) * 0.1,
    }

    x = jax.random.normal(k5, (B, J, Fe, T), jnp.float32)
    timesteps = jnp.array([5, 17], dtype=jnp.int32)
    y = {
        "action": jnp.array([1, 3], dtype=jnp.int32),
        "scale": jnp.array([2.5, 0.0], dtype=jnp.float32),
    }

    inner_model = SyntheticMDM(params, njoints=J, nfeats=Fe)
    cfg_model = ClassifierFreeSampleModel(inner_model)

    result = cfg_model.forward(x, timesteps, y)
    result = jax.block_until_ready(result)

    ref = reference_forward(params, x, timesteps, y)
    assert result.shape == (B, J, Fe, T)
    assert jnp.allclose(result, ref, atol=1e-4, rtol=1e-4)

    # Also exercise the kernel-layout entry point used inside a sampling loop.
    res_btf = jax.block_until_ready(
        cfg_model.forward_btf(pytorch_to_btf(x), timesteps, y))
    assert jnp.allclose(btf_to_pytorch(res_btf, J, Fe), ref, atol=1e-4, rtol=1e-4)

    print("KERNEL_OK")
</pallas_src>

<mosaic_0001>
module attributes {stable_mosaic.version = 11 : i64} {
  func.func @_fused_cfg_kernel(%arg0: i32, %arg1: memref<2x16x16xf32, #tpu.memory_space<vmem>>, %arg2: memref<16x16xf32, #tpu.memory_space<vmem>>, %arg3: memref<2x32xf32, #tpu.memory_space<vmem>>, %arg4: memref<2x32xf32, #tpu.memory_space<vmem>>, %arg5: memref<32x16xf32, #tpu.memory_space<vmem>>, %arg6: memref<2x1xf32, #tpu.memory_space<vmem>>, %arg7: memref<2x16x16xf32, #tpu.memory_space<vmem>>) attributes {dimension_semantics = [#tpu.dimension_semantics<parallel>], iteration_bounds = array<i64: 1>, scalar_prefetch = 0 : i64, scratch_operands = 0 : i64, tpu.core_type = #tpu.core_type<tc>, window_params = [{transform_indices = @transform_0, window_bounds = array<i64: 2, 16, 16>}, {pipeline_mode = #tpu.pipeline_mode<synchronous>, transform_indices = @transform_1, window_bounds = array<i64: 16, 16>}, {transform_indices = @transform_2, window_bounds = array<i64: 2, 32>}, {transform_indices = @transform_3, window_bounds = array<i64: 2, 32>}, {pipeline_mode = #tpu.pipeline_mode<synchronous>, transform_indices = @transform_4, window_bounds = array<i64: 32, 16>}, {transform_indices = @transform_5, window_bounds = array<i64: 2, 1>}, {transform_indices = @transform_6, window_bounds = array<i64: 2, 16, 16>}]} {
    %c0 = arith.constant 0 : index
    %c0_0 = arith.constant 0 : index
    %c0_1 = arith.constant 0 : index
    %0 = vector.load %arg1[%c0, %c0_0, %c0_1] : memref<2x16x16xf32, #tpu.memory_space<vmem>>, vector<2x16x16xf32>
    %1 = vector.shape_cast %0 : vector<2x16x16xf32> to vector<32x16xf32>
    %c0_2 = arith.constant 0 : index
    %c0_3 = arith.constant 0 : index
    %2 = vector.load %arg2[%c0_2, %c0_3] : memref<16x16xf32, #tpu.memory_space<vmem>>, vector<16x16xf32>
    %cst = arith.constant dense<0.000000e+00> : vector<32x16xf32>
    %3 = tpu.matmul %1, %2, %cst {dimension_numbers = #tpu.dot_dimension_numbers<[1], [0], [0], [1], [0, 0, 1, 1], [], []>} : vector<32x16xf32>, vector<16x16xf32>, vector<32x16xf32> -> vector<32x16xf32>
    %c0_4 = arith.constant 0 : index
    %c0_5 = arith.constant 0 : index
    %4 = vector.load %arg3[%c0_4, %c0_5] : memref<2x32xf32, #tpu.memory_space<vmem>>, vector<2x32xf32>
    %c0_6 = arith.constant 0 : index
    %c0_7 = arith.constant 0 : index
    %5 = vector.load %arg5[%c0_6, %c0_7] : memref<32x16xf32, #tpu.memory_space<vmem>>, vector<32x16xf32>
    %cst_8 = arith.constant dense<0.000000e+00> : vector<2x16xf32>
    %6 = tpu.matmul %4, %5, %cst_8 {dimension_numbers = #tpu.dot_dimension_numbers<[1], [0], [0], [1], [0, 0, 1, 1], [], []>} : vector<2x32xf32>, vector<32x16xf32>, vector<2x16xf32> -> vector<2x16xf32>
    %c0_9 = arith.constant 0 : index
    %c0_10 = arith.constant 0 : index
    %7 = vector.load %arg4[%c0_9, %c0_10] : memref<2x32xf32, #tpu.memory_space<vmem>>, vector<2x32xf32>
    %c0_11 = arith.constant 0 : index
    %c0_12 = arith.constant 0 : index
    %8 = vector.load %arg5[%c0_11, %c0_12] : memref<32x16xf32, #tpu.memory_space<vmem>>, vector<32x16xf32>
    %cst_13 = arith.constant dense<0.000000e+00> : vector<2x16xf32>
    %9 = tpu.matmul %7, %8, %cst_13 {dimension_numbers = #tpu.dot_dimension_numbers<[1], [0], [0], [1], [0, 0, 1, 1], [], []>} : vector<2x32xf32>, vector<32x16xf32>, vector<2x16xf32> -> vector<2x16xf32>
    %c0_14 = arith.constant 0 : index
    %c0_15 = arith.constant 0 : index
    %10 = vector.load %arg6[%c0_14, %c0_15] : memref<2x1xf32, #tpu.memory_space<vmem>>, vector<2x1xf32>
    %11 = arith.subf %6, %9 : vector<2x16xf32>
    %12 = vector.broadcast %10 : vector<2x1xf32> to vector<2x16xf32>
    %13 = arith.mulf %12, %11 : vector<2x16xf32>
    %14 = arith.addf %9, %13 : vector<2x16xf32>
    %15 = vector.shape_cast %3 : vector<32x16xf32> to vector<2x16x16xf32>
    %16 = vector.shape_cast %14 : vector<2x16xf32> to vector<2x1x16xf32>
    %17 = vector.broadcast %16 : vector<2x1x16xf32> to vector<2x16x16xf32>
    %18 = arith.addf %15, %17 : vector<2x16x16xf32>
    %c0_16 = arith.constant 0 : index
    %c0_17 = arith.constant 0 : index
    %c0_18 = arith.constant 0 : index
    %19 = vector.load %arg7[%c0_16, %c0_17, %c0_18] : memref<2x16x16xf32, #tpu.memory_space<vmem>>, vector<2x16x16xf32>
    tpu.vector_store %arg7[%c0_16, %c0_17, %c0_18], %18 {strides = array<i32>} : memref<2x16x16xf32, #tpu.memory_space<vmem>>, vector<2x16x16xf32>,
    return
  }
  func.func @transform_0(%arg0: i32) -> (i32, i32, i32) {
    %c0_i32 = arith.constant 0 : i32
    %c0_i32_0 = arith.constant 0 : i32
    %c0_i32_1 = arith.constant 0 : i32
    return %arg0, %c0_i32, %c0_i32_0 : i32, i32, i32
  }
  func.func @transform_1(%arg0: i32) -> (i32, i32) {
    %c0_i32 = arith.constant 0 : i32
    %c0_i32_0 = arith.constant 0 : i32
    %c0_i32_1 = arith.constant 0 : i32
    return %c0_i32, %c0_i32_0 : i32, i32
  }
  func.func @transform_2(%arg0: i32) -> (i32, i32) {
    %c0_i32 = arith.constant 0 : i32
    %c0_i32_0 = arith.constant 0 : i32
    return %arg0, %c0_i32 : i32, i32
  }
  func.func @transform_3(%arg0: i32) -> (i32, i32) {
    %c0_i32 = arith.constant 0 : i32
    %c0_i32_0 = arith.constant 0 : i32
    return %arg0, %c0_i32 : i32, i32
  }
  func.func @transform_4(%arg0: i32) -> (i32, i32) {
    %c0_i32 = arith.constant 0 : i32
    %c0_i32_0 = arith.constant 0 : i32
    %c0_i32_1 = arith.constant 0 : i32
    return %c0_i32, %c0_i32_0 : i32, i32
  }
  func.func @transform_5(%arg0: i32) -> (i32, i32) {
    %c0_i32 = arith.constant 0 : i32
    %c0_i32_0 = arith.constant 0 : i32
    return %arg0, %c0_i32 : i32, i32
  }
  func.func @transform_6(%arg0: i32) -> (i32, i32, i32) {
    %c0_i32 = arith.constant 0 : i32
    %c0_i32_0 = arith.constant 0 : i32
    %c0_i32_1 = arith.constant 0 : i32
    return %arg0, %c0_i32, %c0_i32_0 : i32, i32, i32
  }
}

</mosaic_0001>

<bundles_post_ra>
// kernel: tpu_custom_call.1
= control target key start
LH: loop header
LB: loop body
LE: loop exit
PB: predicated region body
PF: predicated region fallthrough
CT: control target
= control target key end

     0   :  { %vm30_vm0 = vcmask 130048   ;;  %v431_v4 = vmov 0.0   ;;  %s523_s0 = inlined_call_operand.vmem [shape: f32[2,16,16], index: 0, kind: input, shape index: {}]   ;;  %s524_s1 = inlined_call_operand.vmem [shape: f32[16,16], index: 1, kind: input, shape index: {}]   ;;  %s525_s2 = inlined_call_operand.vmem [shape: f32[2,32], index: 2, kind: input, shape index: {}]   ;;  %s526_s3 = inlined_call_operand.vmem [shape: f32[2,32], index: 3, kind: input, shape index: {}]   ;;  %s527_s4 = inlined_call_operand.vmem [shape: f32[32,16], index: 4, kind: input, shape index: {}]   ;;  %s528_s5 = inlined_call_operand.vmem [shape: f32[2,1], index: 5, kind: input, shape index: {}]   ;;  %s529_s6 = inlined_call_operand.hbm [shape: f32[2,16,16], index: 6, kind: output, shape index: {}]  }
   0x1   :  { %v29_v0 = vld [vmem:[%s524_s1 + $0x8] sm:$0xff]  ;;  %v28_v1 = vld [vmem:[%s524_s1] sm:$0xff]  ;;  %v132_v3 = vld [vmem:[%s527_s4 + $0x18] sm:$0xff]  ;;  %379 = vmatprep.subr.mxu1 %v431_v4 }
   0x2   :  { %v24_v2 = vld [vmem:[%s523_s0] sm:$0xff]  ;;  %369 = vmatprep.subr.mxu0 %v29_v0  ;;  %v25_v5 = vld [vmem:[%s523_s0 + $0x8] sm:$0xff]  ;;  %380 = vmatpush3.msra.mxu1 %v132_v3  ;;  %v131_v6 = vld [vmem:[%s527_s4 + $0x10] sm:$0xff] }
   0x3   :  { %373 = vmatprep.mubr.msk.f32.mxu0 %vm30_vm0, %v24_v2  ;;  %370 = vmatpush3.msra.mxu0 %v29_v0  ;;  %v26_v7 = vld [vmem:[%s523_s0 + $0x10] sm:$0xff] }
   0x4   :  { %371 = vmatprep.subr.mxu0 %v28_v1  ;;  %381 = vmatprep.subr.mxu1 %v431_v4 }
   0x5   :  { %372 = vmatpush3.msra.mxu0 %v28_v1 }
   0x6   :  { %11 = vsyncpa [#allocation3], 0  ;;  %374 = vmatmul.mubr.msk.f32.vlgmr.msra.gmra.mxu0 %vm30_vm0, %v25_v5  ;;  %390 = vmatprep.subr.mxu0 %v431_v4  ;;  %v27_v8 = vld [vmem:[%s523_s0 + $0x18] sm:$0xff]  ;;  %v130_v9 = vld [vmem:[%s527_s4 + $0x8] sm:$0xff]  ;;  %vm133_vm1 = vcmask 261120   ;;  %vm432_vm2 = vmmov 0   ;;  %v294_v20 = vlaneseq }
   0x7   :  { %391 = vmatpush3.msra.mxu0 %v132_v3  ;;  %382 = vmatpush3.msra.mxu1 %v131_v6  ;;  %v129_v10 = vld [vmem:[%s527_s4] sm:$0xff]  ;;  %v433_v14 = vmov 0   ;;  %v434_v18 = vmov 1966171168  }
   0x8   :  { %392 = vmatprep.subr.mxu0 %v431_v4  ;;  %376 = vmatprep.mubr.msk.f32.mxu0 %vm30_vm0, %v26_v7  ;;  %v128_v11 = vld [vmem:[%s525_s2] sm:$0x3]  ;;  %v292_v19 = vunpack.c.l.s4 %v434_v18  ;;  %v295_v24 = vshrl.u32 %v294_v20, 7  ;;  %s435_s2 = smov [#allocation2]  }
   0x9   :  { %383 = vmatprep.subr.mxu1 %v431_v4  ;;  %393 = vmatpush3.msra.mxu0 %v131_v6  ;;  %v207_v12 = vld [vmem:[%s526_s3] sm:$0x3]  ;;  %s336_s3 = sshll.u32 %s435_s2, 4  ;;  %s337_s3 = int_to_ptr.vmem [resolvable:$true] %s336_s3 }
   0xa   :  { %377 = vmatmul.mubr.msk.f32.gmra.mxu0 %vm30_vm0, %v27_v8  ;;  %384 = vmatpush3.msra.mxu1 %v130_v9  ;;  %v281_v13 = vld [vmem:[%s528_s5] sm:$0x3]  ;;  %v293_v23 = vunpack.c.0.s8 %v292_v19  ;;  %v315_v33 = vsub.s32 0, %v295_v24  ;;  %s409_s5 = scalar_lea.vmem %s337_s3, 512  ;;  %p414_p1 = scmp.lt.s32.totalorder %s337_s3, %s337_s3 }
   0xb   :  { %394 = vmatprep.subr.mxu0 %v431_v4  ;;  %385 = vmatprep.subr.mxu1 %v431_v4  ;;  %p410_p0 = scmp.ne.s32.totalorder %s337_s3, %s409_s5  ;;  %p415_p2 = scmp.lt.s32.totalorder %s409_s5, %s409_s5 }
   0xc   :  { %395 = vmatpush3.msra.mxu0 %v130_v9  ;;  %386 = vmatpush3.msra.mxu1 %v129_v10  ;;  %v296_v30 = vsub.s32 %v293_v23, %v295_v24 }
   0xd   :  { %387 = vmatprep.mubr.msk.f32.mxu1 %vm432_vm2, %v431_v4  ;;  %396 = vmatprep.subr.mxu0 %v431_v4  ;;  %p416_p3 = por %p415_p2, %p414_p1 }
   0xe   :  { %388 = vmatmul.mubr.msk.f32.vlgmr.msra.gmra.mxu1 %vm133_vm1, %v128_v11  ;;  %397 = vmatpush3.msra.mxu0 %v129_v10 }
   0xf   :  { %398 = vmatprep.mubr.msk.f32.mxu0 %vm432_vm2, %v431_v4  ;;  %408 = vset.pattern.permute.xlu0 %v433_v14  ;;  %p417_p4 = pnand %p416_p3, %p410_p0 }
  0x10   :  { %399 = vmatmul.mubr.msk.f32.vlgmr.msra.gmra.mxu0 %vm133_vm1, %v207_v12  ;;  %285 = vperm.xlu0 %408, %v281_v13  }
  0x8b   :  { %v286_v25 = vpop.permute.xlu0 %285 }
  0xc6   :  { %v375_v15 = vpop.f32.mrf.mxu0 }
  0xc8   :  { %v109_v16 = vpop.f32.mrf.mxu0 }
  0xca   :  { %v378_v17 = vpop.f32.mrf.mxu0 }
  0xcc   :  { %v119_v21 = vpop.f32.mrf.mxu0 }
  0xce   :  { %v203_v22 = vpop.f32.mrf.mxu1 }
  0xd0   :  { %v277_v26 = vpop.f32.mrf.mxu0  ;;  %v389_v27 = vpop.f32.mrf.mxu1 }
  0xd1   :  { %v282_v28 = vsub.f32 %v203_v22, %v277_v26 }
  0xd2   :  { %v400_v29 = vpop.f32.mrf.mxu0 }
  0xd3   :  { %v288_v31 = vmul.f32 %v286_v25, %v282_v28 }
  0xd5   :  { %v289_v32 = vadd.f32 %v288_v31, %v277_v26 }
  0xd7   :  { %v297_v34 = vrot.slane %v289_v32, %v296_v30 }
  0xd9   :  { %v298_v35 = vcombine.high %v297_v34, %v297_v34  ;;  %v305_v36 = vrot.slane %v297_v34, %v296_v30 }
  0xdb   :  { %v312_v37 = vrot.slane %v298_v35, %v296_v30  ;;  %v316_v38 = vrot.slane %v305_v36, %v315_v33 }
  0xdd   :  { %v320_v39 = vrot.slane %v312_v37, %v315_v33  ;;  %v323_v40 = vadd.f32 %v316_v38, %v109_v16  ;;  %v324_v41 = vadd.f32 %v375_v15, %v316_v38 }
  0xdf   :  { %v325_v42 = vadd.f32 %v320_v39, %v119_v21  ;;  %v326_v43 = vadd.f32 %v378_v17, %v320_v39  ;;  %327 = vst.msk [vmem:[#allocation2] sm:$0xff] %vm30_vm0, %v323_v40  ;;  %328 = vst.msk [vmem:[#allocation2 + $0x8] sm:$0xff] %vm30_vm0, %v324_v41 }
  0xe1   :  { %329 = vst.msk [vmem:[#allocation2 + $0x10] sm:$0xff] %vm30_vm0, %v325_v42  ;;  %330 = vst.msk [vmem:[#allocation2 + $0x18] sm:$0xff] %vm30_vm0, %v326_v43 }
  0xe2   :  { %420 = shalt.err (!%p417_p4)
}
  0xe3   :  { %s436_s20 = smov 128   ;;  %s437_s21 = smov 8  }
  0xe4   :  { %342 = dma.vmem_to_hbm [thread:$0]  %s337_s3, 512, %s529_s6, [#allocation3], %s436_s20, %s436_s20, %s437_s21  }
  0xe5   :  { %429 = dma.done.wait [#allocation3], 512  }
  0xe6   :  { %430 = vsyncadd [#allocation3], 4294966784 }
  0xe7   :  { %346 = vsyncpa [#allocation3], 1 }

</bundles_post_ra>
